<compile_context>
chip_gen: v7x
topology: tpu7x:2x2x1
jax: 0.10.0
libtpu: 0.0.40
codegen_flags: <defaults>
</compile_context>

<pallas_src>
import jax
import jax.numpy as jnp
from jax import lax
from jax.experimental import pallas as pl
from jax.experimental.pallas import tpu as pltpu

# ----- module hyper-parameters (OUT_LATENT_DIM = {201: 23*5}) ---------------
INPUT_DIM = 201          # time-series length (only valid key of OUT_LATENT_DIM)
NUM_CHANNELS = 4         # conv1 input channels
NUM_FILTERS = 5          # flatten dim == 23*5 == OUT_LATENT_DIM[201]
OUTPUT_DIM = 32
BATCH = 2

K1, K2 = 6, 5
C, F, O = NUM_CHANNELS, NUM_FILTERS, OUTPUT_DIM
KC = K1 * C                     # 24  im2col width for conv1
KC1 = KC + 1                    # 25  (+ ones column -> conv1 bias folded in)
L1 = INPUT_DIM - K1 + 1         # 196 conv1 valid output length
LP = (L1 - 4) // 4 + 1          # 49  after maxpool(4,4)
PQ = 56                         # 49 padded to a multiple of 8 sublanes
L2 = (LP - K2) // 2 + 1         # 23  conv2 valid, stride 2
BPQ = BATCH * PQ                # 112 (one pooled slab: both batches, padded)
ROW_WC = 32                     # 8-aligned start of fused conv2+fc weights
ROW_BC = ROW_WC + F * BPQ       # 592 fused bias row
PACK_ROWS = 600                 # 593 padded to a multiple of 8
assert L2 * F == 23 * 5


def temporal_encoder_kernel(x_ref, p_ref, out_ref):
    # x_ref  : (4*BPQ, KC1) = (448, 25) phase-major folded im2col (+ ones col)
    # p_ref  : (PACK_ROWS, O) packed weights (W1+b1 | fused W_comb | b_comb)
    # out_ref: (B, O)

    # ---- conv1 (+ bias via ones column) as ONE MXU matmul, relu on the VPU --
    w1b = p_ref[0:KC1, 0:F]                                        # (25, 5)
    c1 = jnp.dot(x_ref[...], w1b, preferred_element_type=jnp.float32)
    c1 = jnp.maximum(c1, 0.0)                                      # (448, 5)

    # ---- maxpool1d(4,4): rows are phase-major -> max of 4 contiguous slabs --
    pooled = jnp.maximum(jnp.maximum(c1[0:BPQ], c1[BPQ:2 * BPQ]),
                         jnp.maximum(c1[2 * BPQ:3 * BPQ], c1[3 * BPQ:4 * BPQ]))
    # pooled: (112, 5), rows = b*56 + q (q in [0,49), pad rows are zeros)

    # ---- conv2 + fc fused into precomputed W_comb: 5 VPU FMAs on (112, 32) --
    acc = pooled[:, 0:1] * p_ref[ROW_WC:ROW_WC + BPQ, :]
    for f in range(1, F):
        lo = ROW_WC + f * BPQ
        acc = acc + pooled[:, f:f + 1] * p_ref[lo:lo + BPQ, :]     # (112, 32)

    b_comb = p_ref[ROW_BC:ROW_BC + 1, :]                           # (1, 32)
    outs = [jnp.sum(acc[b * PQ:(b + 1) * PQ], axis=0, keepdims=True) + b_comb
            for b in range(BATCH)]
    out_ref[...] = jnp.concatenate(outs, axis=0)                   # one (B,O) store


def prepare_params(w1, b1, w2, b2, wfc, bfc):
    """Pack / pre-fuse all weights into ONE f32 buffer. Run once, off hot path."""
    w1, b1 = w1.astype(jnp.float32), b1.astype(jnp.float32)
    w2, b2 = w2.astype(jnp.float32), b2.astype(jnp.float32)
    wfc, bfc = wfc.astype(jnp.float32), bfc.astype(jnp.float32)

    # conv1 weights as (KC, F) with bias folded in as a 25th row.
    w1_m = jnp.transpose(w1, (2, 1, 0)).reshape(KC, F)    # [k*C+c, f] = w1[f,c,k]
    w1b = jnp.concatenate([w1_m, b1.reshape(1, F)], axis=0)        # (25, 5)

    # Algebraic fusion of conv2 + fc (torch flatten order of*L2 + t):
    #   out[b,o] = b_comb[o] + sum_{f,p} pooled[b,f,p] * W_comb[p,f,o]
    wfc3 = wfc.reshape(O, F, L2)                                   # [o, of, t]
    tt = jnp.arange(L2)[:, None, None]
    kk = jnp.arange(K2)[None, :, None]
    pp = jnp.arange(LP)[None, None, :]
    T = (2 * tt + kk == pp).astype(jnp.float32)                    # (L2, K2, LP)
    Wc = jnp.einsum('aik,oat,tkp->pio', w2, wfc3, T)               # (LP, F, O)
    b_comb = bfc + jnp.einsum('oat,a->o', wfc3, b2)                # (O,)

    pack = jnp.zeros((PACK_ROWS, O), jnp.float32)
    pack = pack.at[0:KC1, 0:F].set(w1b)
    for f in range(F):
        blk = jnp.zeros((PQ, O), jnp.float32).at[0:LP].set(Wc[:, f, :])
        pack = pack.at[ROW_WC + f * BPQ: ROW_WC + (f + 1) * BPQ].set(
            jnp.tile(blk, (BATCH, 1)))                             # (112, 32)
    pack = pack.at[ROW_BC].set(b_comb)
    return pack


@jax.jit
def temporal_encoder(x, w_pack):
    """x: (B, C, L) float32 (PyTorch NCL); w_pack from prepare_params."""
    B = x.shape[0]
    assert B == BATCH
    x_t = jnp.transpose(x, (0, 2, 1)).astype(jnp.float32)          # (B, L, C)
    # im2col + ones column (folds conv1 bias into the matmul)
    cols = [x_t[:, k:k + L1, :] for k in range(K1)] + \
           [jnp.ones((B, L1, 1), jnp.float32)]
    x_col = jnp.concatenate(cols, axis=2)                          # (B, 196, 25)
    # phase-major reorder: row = j*(B*PQ) + b*PQ + q  with t = 4q + j
    x_ph = x_col.reshape(B, LP, 4, KC1).transpose(2, 0, 1, 3)      # (4, B, 49, 25)
    x_ph = jnp.pad(x_ph, ((0, 0), (0, 0), (0, PQ - LP), (0, 0)))   # (4, B, 56, 25)
    x_fold = x_ph.reshape(4 * B * PQ, KC1)                         # (448, 25)

    out = pl.pallas_call(
        temporal_encoder_kernel,
        out_shape=jax.ShapeDtypeStruct((B, O), jnp.float32),
        grid=(1,),                                   # single step: batch folded
        in_specs=[
            pl.BlockSpec((4 * B * PQ, KC1), lambda i: (0, 0)),
            pl.BlockSpec((PACK_ROWS, O), lambda i: (0, 0)),
        ],
        out_specs=pl.BlockSpec((B, O), lambda i: (0, 0)),
        compiler_params=pltpu.CompilerParams(
            dimension_semantics=("arbitrary",),
            allow_input_fusion=[True, False],   # fuse im2col producer into call
            vmem_limit_bytes=8 * 1024 * 1024),
    )(x_fold, w_pack)
    return out


def reference(x, w1, b1, w2, b2, wfc, bfc):
    """Pure-JAX (XLA) replica of the PyTorch forward, for verification."""
    y = lax.conv_general_dilated(x, w1, window_strides=(1,), padding='VALID',
                                 dimension_numbers=('NCH', 'OIH', 'NCH'))
    y = jnp.maximum(y + b1[None, :, None], 0.0)
    y = lax.reduce_window(y, -jnp.inf, lax.max, (1, 1, 4), (1, 1, 4), 'VALID')
    y = lax.conv_general_dilated(y, w2, window_strides=(2,), padding='VALID',
                                 dimension_numbers=('NCH', 'OIH', 'NCH'))
    y = y + b2[None, :, None]
    h = y.reshape(y.shape[0], -1)
    return h @ wfc.T + bfc


if __name__ == "__main__":
    key = jax.random.PRNGKey(0)
    ks = jax.random.split(key, 8)

    # deterministic synthetic parameters (PyTorch layouts)
    x = jax.random.normal(ks[0], (BATCH, NUM_CHANNELS, INPUT_DIM), jnp.float32)
    w1 = jax.random.normal(ks[1], (NUM_FILTERS, NUM_CHANNELS, K1), jnp.float32) * 0.2
    b1 = jax.random.normal(ks[2], (NUM_FILTERS,), jnp.float32) * 0.1
    w2 = jax.random.normal(ks[3], (NUM_FILTERS, NUM_FILTERS, K2), jnp.float32) * 0.2
    b2 = jax.random.normal(ks[4], (NUM_FILTERS,), jnp.float32) * 0.1
    wfc = jax.random.normal(ks[5], (OUTPUT_DIM, L2 * NUM_FILTERS), jnp.float32) * 0.1
    bfc = jax.random.normal(ks[6], (OUTPUT_DIM,), jnp.float32) * 0.1

    w_pack = jax.block_until_ready(prepare_params(w1, b1, w2, b2, wfc, bfc))

    out = temporal_encoder(x, w_pack)
    out = jax.block_until_ready(out)

    ref = reference(x, w1, b1, w2, b2, wfc, bfc)
    assert out.shape == (BATCH, OUTPUT_DIM)
    assert jnp.allclose(out, ref, rtol=1e-4, atol=1e-4), \
        f"max abs err {jnp.max(jnp.abs(out - ref))}"

    print("KERNEL_OK")
</pallas_src>

<mosaic_0001>
module attributes {stable_mosaic.version = 11 : i64} {
  func.func @temporal_encoder_kernel(%arg0: i32, %arg1: memref<448x25xf32, #tpu.memory_space<vmem>>, %arg2: memref<600x32xf32, #tpu.memory_space<vmem>>, %arg3: memref<2x32xf32, #tpu.memory_space<vmem>>) attributes {dimension_semantics = [#tpu.dimension_semantics<arbitrary>], iteration_bounds = array<i64: 1>, scalar_prefetch = 0 : i64, scratch_operands = 0 : i64, tpu.core_type = #tpu.core_type<tc>, window_params = [{pipeline_mode = #tpu.pipeline_mode<synchronous>, transform_indices = @transform_0, window_bounds = array<i64: 448, 25>}, {pipeline_mode = #tpu.pipeline_mode<synchronous>, transform_indices = @transform_1, window_bounds = array<i64: 600, 32>}, {pipeline_mode = #tpu.pipeline_mode<synchronous>, transform_indices = @transform_2, window_bounds = array<i64: 2, 32>}]} {
    %c0 = arith.constant 0 : index
    %c0_0 = arith.constant 0 : index
    %0 = vector.load %arg2[%c0, %c0_0] : memref<600x32xf32, #tpu.memory_space<vmem>>, vector<25x5xf32>
    %c0_1 = arith.constant 0 : index
    %c0_2 = arith.constant 0 : index
    %1 = vector.load %arg1[%c0_1, %c0_2] : memref<448x25xf32, #tpu.memory_space<vmem>>, vector<448x25xf32>
    %cst = arith.constant dense<0.000000e+00> : vector<448x5xf32>
    %2 = tpu.matmul %1, %0, %cst {dimension_numbers = #tpu.dot_dimension_numbers<[1], [0], [0], [1], [0, 0, 1, 1], [], []>} : vector<448x25xf32>, vector<25x5xf32>, vector<448x5xf32> -> vector<448x5xf32>
    %cst_3 = arith.constant 0.000000e+00 : f32
    %3 = vector.broadcast %cst_3 : f32 to vector<448x5xf32>
    %4 = arith.maximumf %2, %3 : vector<448x5xf32>
    %5 = vector.extract_strided_slice %4 {offsets = [0, 0], sizes = [112, 5], strides = [1, 1]} : vector<448x5xf32> to vector<112x5xf32>
    %6 = vector.extract_strided_slice %4 {offsets = [112, 0], sizes = [112, 5], strides = [1, 1]} : vector<448x5xf32> to vector<112x5xf32>
    %7 = arith.maximumf %5, %6 : vector<112x5xf32>
    %8 = vector.extract_strided_slice %4 {offsets = [224, 0], sizes = [112, 5], strides = [1, 1]} : vector<448x5xf32> to vector<112x5xf32>
    %9 = vector.extract_strided_slice %4 {offsets = [336, 0], sizes = [112, 5], strides = [1, 1]} : vector<448x5xf32> to vector<112x5xf32>
    %10 = arith.maximumf %8, %9 : vector<112x5xf32>
    %11 = arith.maximumf %7, %10 : vector<112x5xf32>
    %12 = vector.extract_strided_slice %11 {offsets = [0, 0], sizes = [112, 1], strides = [1, 1]} : vector<112x5xf32> to vector<112x1xf32>
    %c32 = arith.constant 32 : index
    %c0_4 = arith.constant 0 : index
    %13 = vector.load %arg2[%c32, %c0_4] : memref<600x32xf32, #tpu.memory_space<vmem>>, vector<112x32xf32>
    %14 = vector.broadcast %12 : vector<112x1xf32> to vector<112x32xf32>
    %15 = arith.mulf %14, %13 : vector<112x32xf32>
    %16 = vector.extract_strided_slice %11 {offsets = [0, 1], sizes = [112, 1], strides = [1, 1]} : vector<112x5xf32> to vector<112x1xf32>
    %c144 = arith.constant 144 : index
    %c0_5 = arith.constant 0 : index
    %17 = vector.load %arg2[%c144, %c0_5] : memref<600x32xf32, #tpu.memory_space<vmem>>, vector<112x32xf32>
    %18 = vector.broadcast %16 : vector<112x1xf32> to vector<112x32xf32>
    %19 = arith.mulf %18, %17 : vector<112x32xf32>
    %20 = arith.addf %15, %19 : vector<112x32xf32>
    %21 = vector.extract_strided_slice %11 {offsets = [0, 2], sizes = [112, 1], strides = [1, 1]} : vector<112x5xf32> to vector<112x1xf32>
    %c256 = arith.constant 256 : index
    %c0_6 = arith.constant 0 : index
    %22 = vector.load %arg2[%c256, %c0_6] : memref<600x32xf32, #tpu.memory_space<vmem>>, vector<112x32xf32>
    %23 = vector.broadcast %21 : vector<112x1xf32> to vector<112x32xf32>
    %24 = arith.mulf %23, %22 : vector<112x32xf32>
    %25 = arith.addf %20, %24 : vector<112x32xf32>
    %26 = vector.extract_strided_slice %11 {offsets = [0, 3], sizes = [112, 1], strides = [1, 1]} : vector<112x5xf32> to vector<112x1xf32>
    %c368 = arith.constant 368 : index
    %c0_7 = arith.constant 0 : index
    %27 = vector.load %arg2[%c368, %c0_7] : memref<600x32xf32, #tpu.memory_space<vmem>>, vector<112x32xf32>
    %28 = vector.broadcast %26 : vector<112x1xf32> to vector<112x32xf32>
    %29 = arith.mulf %28, %27 : vector<112x32xf32>
    %30 = arith.addf %25, %29 : vector<112x32xf32>
    %31 = vector.extract_strided_slice %11 {offsets = [0, 4], sizes = [112, 1], strides = [1, 1]} : vector<112x5xf32> to vector<112x1xf32>
    %c480 = arith.constant 480 : index
    %c0_8 = arith.constant 0 : index
    %32 = vector.load %arg2[%c480, %c0_8] : memref<600x32xf32, #tpu.memory_space<vmem>>, vector<112x32xf32>
    %33 = vector.broadcast %31 : vector<112x1xf32> to vector<112x32xf32>
    %34 = arith.mulf %33, %32 : vector<112x32xf32>
    %35 = arith.addf %30, %34 : vector<112x32xf32>
    %c592 = arith.constant 592 : index
    %c0_9 = arith.constant 0 : index
    %36 = vector.load %arg2[%c592, %c0_9] : memref<600x32xf32, #tpu.memory_space<vmem>>, vector<1x32xf32>
    %37 = vector.extract_strided_slice %35 {offsets = [0, 0], sizes = [56, 32], strides = [1, 1]} : vector<112x32xf32> to vector<56x32xf32>
    %cst_10 = arith.constant dense<0.000000e+00> : vector<32xf32>
    %38 = vector.multi_reduction <add>, %37, %cst_10 [0] : vector<56x32xf32> to vector<32xf32>
    %39 = vector.shape_cast %38 : vector<32xf32> to vector<1x32xf32>
    %40 = arith.addf %39, %36 : vector<1x32xf32>
    %41 = vector.extract_strided_slice %35 {offsets = [56, 0], sizes = [56, 32], strides = [1, 1]} : vector<112x32xf32> to vector<56x32xf32>
    %cst_11 = arith.constant dense<0.000000e+00> : vector<32xf32>
    %42 = vector.multi_reduction <add>, %41, %cst_11 [0] : vector<56x32xf32> to vector<32xf32>
    %43 = vector.shape_cast %42 : vector<32xf32> to vector<1x32xf32>
    %44 = arith.addf %43, %36 : vector<1x32xf32>
    %45 = tpu.concatenate %40, %44 in 0 : vector<1x32xf32>, vector<1x32xf32> -> vector<2x32xf32>
    %c0_12 = arith.constant 0 : index
    %c0_13 = arith.constant 0 : index
    %46 = vector.load %arg3[%c0_12, %c0_13] : memref<2x32xf32, #tpu.memory_space<vmem>>, vector<2x32xf32>
    tpu.vector_store %arg3[%c0_12, %c0_13], %45 {strides = array<i32>} : memref<2x32xf32, #tpu.memory_space<vmem>>, vector<2x32xf32>,
    return
  }
  func.func @transform_0(%arg0: i32) -> (i32, i32) {
    %c0_i32 = arith.constant 0 : i32
    %c0_i32_0 = arith.constant 0 : i32
    %c0_i32_1 = arith.constant 0 : i32
    return %c0_i32, %c0_i32_0 : i32, i32
  }
  func.func @transform_1(%arg0: i32) -> (i32, i32) {
    %c0_i32 = arith.constant 0 : i32
    %c0_i32_0 = arith.constant 0 : i32
    %c0_i32_1 = arith.constant 0 : i32
    return %c0_i32, %c0_i32_0 : i32, i32
  }
  func.func @transform_2(%arg0: i32) -> (i32, i32) {
    %c0_i32 = arith.constant 0 : i32
    %c0_i32_0 = arith.constant 0 : i32
    %c0_i32_1 = arith.constant 0 : i32
    return %c0_i32, %c0_i32_0 : i32, i32
  }
}

</mosaic_0001>

<bundles_post_ra>
// kernel: temporal_encoder.1
= control target key start
LH: loop header
LB: loop body
LE: loop exit
PB: predicated region body
PF: predicated region fallthrough
CT: control target
= control target key end

     0   :  { %vm241_vm0 = vcmask 1040384   ;;  %vm72_vm1 = vcmask 203776   ;;  %vm1562_vm2 = vmmov 1   ;;  %s2308_s0 = inlined_call_operand.vmem [shape: f32[448,25], index: 0, kind: input, shape index: {}]   ;;  %s2309_s1 = inlined_call_operand.vmem [shape: f32[600,32], index: 1, kind: input, shape index: {}]   ;;  %s2310_s2 = inlined_call_operand.hbm [shape: f32[2,32], index: 2, kind: output, shape index: {}]  }
   0x1   :  { %v12_v0 = vld [vmem:[%s2309_s1] sm:$0xff]  ;;  %v13_v1 = vld [vmem:[%s2309_s1 + $0x8] sm:$0xff]  ;;  %v14_v2 = vld [vmem:[%s2309_s1 + $0x10] sm:$0xff] }
   0x2   :  { %v1449_v3 = vpack.c.bf16 %v13_v1, %v12_v0  ;;  %v15_v4 = vld [vmem:[%s2309_s1 + $0x18] sm:$0x1]  ;;  %v16_v5 = vld [vmem:[%s2308_s0] sm:$0xff]  ;;  %vm1454_vm3 = vmpackc.low %vm241_vm0, %vm1562_vm2 }
   0x3   :  { %v1453_v6 = vpack.c.bf16 %v15_v4, %v14_v2  ;;  %1365 = vmatprep.mubr.msk.f32.mxu0 %vm72_vm1, %v16_v5  ;;  %v44_v7 = vld [vmem:[%s2308_s0 + $0xe0] sm:$0xff]  ;;  %v17_v8 = vld [vmem:[%s2308_s0 + $0x8] sm:$0xff]  ;;  %v18_v10 = vld [vmem:[%s2308_s0 + $0x10] sm:$0xff] }
   0x4   :  { %1450 = vmatprep.subr.bf16.mxu0 %v1449_v3  ;;  %1459 = vmatprep.subr.bf16.mxu1 %v1449_v3  ;;  %v45_v9 = vld [vmem:[%s2308_s0 + $0xe8] sm:$0xff]  ;;  %v46_v11 = vld [vmem:[%s2308_s0 + $0xf0] sm:$0xff]  ;;  %v19_v12 = vld [vmem:[%s2308_s0 + $0x18] sm:$0xff] }
   0x5   :  { %1452 = vmatpush3.bf16.msra.mxu0 %v1449_v3  ;;  %1461 = vmatpush3.bf16.msra.mxu1 %v1449_v3  ;;  %v47_v13 = vld [vmem:[%s2308_s0 + $0xf8] sm:$0xff]  ;;  %v20_v14 = vld [vmem:[%s2308_s0 + $0x20] sm:$0xff]  ;;  %v21_v16 = vld [vmem:[%s2308_s0 + $0x28] sm:$0xff] }
   0x6   :  { %1455 = vmatprep.subr.msk.bf16.mxu0 %vm1454_vm3, %v1453_v6  ;;  %1460 = vmatprep.subr.msk.bf16.mxu1 %vm1454_vm3, %v1453_v6  ;;  %v48_v15 = vld [vmem:[%s2308_s0 + $0x100] sm:$0xff]  ;;  %v49_v17 = vld [vmem:[%s2308_s0 + $0x108] sm:$0xff]  ;;  %v22_v18 = vld [vmem:[%s2308_s0 + $0x30] sm:$0xff] }
   0x7   :  { %1407 = vmatprep.mubr.msk.f32.mxu1 %vm72_vm1, %v44_v7  ;;  %v50_v19 = vld [vmem:[%s2308_s0 + $0x110] sm:$0xff]  ;;  %v23_v20 = vld [vmem:[%s2308_s0 + $0x38] sm:$0xff] }
   0x8   :  { %v51_v21 = vld [vmem:[%s2308_s0 + $0x118] sm:$0xff] }
   0x9   :  { %1458 = vmatpush3.bf16.msk.msra.mxu0 %vm1454_vm3, %v1453_v6  ;;  %1462 = vmatpush3.bf16.msk.msra.mxu1 %vm1454_vm3, %v1453_v6 }
   0xc   :  { %1366 = vmatmul.mubr.msk.f32.vlgmr.msra.gmra.mrb[0].mxu0 %vm72_vm1, %v17_v8  ;;  %1408 = vmatmul.mubr.msk.f32.vlgmr.msra.gmra.mrb[0].mxu1 %vm72_vm1, %v45_v9 }
   0xd   :  { %1368 = vmatprep.mubr.msk.f32.mxu0 %vm72_vm1, %v18_v10  ;;  %1410 = vmatprep.mubr.msk.f32.mxu1 %vm72_vm1, %v46_v11 }
  0x10   :  { %1369 = vmatmul.mubr.msk.f32.gmra.mrb[2].mxu0 %vm72_vm1, %v19_v12  ;;  %1411 = vmatmul.mubr.msk.f32.gmra.mrb[2].mxu1 %vm72_vm1, %v47_v13 }
  0x11   :  { %1371 = vmatprep.mubr.msk.f32.mxu0 %vm72_vm1, %v20_v14  ;;  %1413 = vmatprep.mubr.msk.f32.mxu1 %vm72_vm1, %v48_v15 }
  0x14   :  { %1372 = vmatmul.mubr.msk.f32.gmra.mrb[4].mxu0 %vm72_vm1, %v21_v16  ;;  %1414 = vmatmul.mubr.msk.f32.gmra.mrb[4].mxu1 %vm72_vm1, %v49_v17 }
  0x15   :  { %1374 = vmatprep.mubr.msk.f32.mxu0 %vm72_vm1, %v22_v18  ;;  %1416 = vmatprep.mubr.msk.f32.mxu1 %vm72_vm1, %v50_v19 }
  0x16   :  { %7 = vsyncpa [#allocation3], 0  ;;  %v24_v22 = vld [vmem:[%s2308_s0 + $0x40] sm:$0xff]  ;;  %v25_v24 = vld [vmem:[%s2308_s0 + $0x48] sm:$0xff]  ;;  %v1563_v62 = vmov 1   ;;  %v1564_v63 = vmov 0  }
  0x17   :  { %v52_v23 = vld [vmem:[%s2308_s0 + $0x120] sm:$0xff]  ;;  %v53_v25 = vld [vmem:[%s2308_s0 + $0x128] sm:$0xff]  ;;  %v26_v26 = vld [vmem:[%s2308_s0 + $0x50] sm:$0xff]  ;;  %1471 = vset.pattern.permute.xlu1 %v1563_v62  ;;  %1470 = vset.pattern.permute.xlu0 %v1564_v63  ;;  %vm1179_vm4 = vcmask 261120   ;;  %s1568_s14 = smov [#allocation2]   ;;  %vm1224_vm5 = vcmask 254976  }
  0x18   :  { %1375 = vmatmul.mubr.msk.f32.gmra.mrb[6].mxu0 %vm72_vm1, %v23_v20  ;;  %1417 = vmatmul.mubr.msk.f32.gmra.mrb[6].mxu1 %vm72_vm1, %v51_v21  ;;  %v54_v27 = vld [vmem:[%s2308_s0 + $0x130] sm:$0xff]  ;;  %v27_v28 = vld [vmem:[%s2308_s0 + $0x58] sm:$0xff]  ;;  %v28_v30 = vld [vmem:[%s2308_s0 + $0x60] sm:$0xff]  ;;  %s1232_s15 = sshll.u32 %s1568_s14, 4  ;;  %s1233_s15 = int_to_ptr.vmem [resolvable:$true] %s1232_s15 }
  0x19   :  { %1377 = vmatprep.mubr.msk.f32.mxu0 %vm72_vm1, %v24_v22  ;;  %1419 = vmatprep.mubr.msk.f32.mxu1 %vm72_vm1, %v52_v23  ;;  %v55_v29 = vld [vmem:[%s2308_s0 + $0x138] sm:$0xff]  ;;  %v56_v31 = vld [vmem:[%s2308_s0 + $0x140] sm:$0xff]  ;;  %v29_v32 = vld [vmem:[%s2308_s0 + $0x68] sm:$0xff]  ;;  %s1538_s16 = scalar_lea.vmem %s1233_s15, 32  ;;  %p1543_p1 = scmp.lt.s32.totalorder %s1233_s15, %s1233_s15 }
  0x1a   :  { %v57_v33 = vld [vmem:[%s2308_s0 + $0x148] sm:$0xff]  ;;  %v30_v34 = vld [vmem:[%s2308_s0 + $0x70] sm:$0xff]  ;;  %v31_v36 = vld [vmem:[%s2308_s0 + $0x78] sm:$0xff]  ;;  %p1539_p0 = scmp.ne.s32.totalorder %s1233_s15, %s1538_s16  ;;  %p1544_p2 = scmp.lt.s32.totalorder %s1538_s16, %s1538_s16 }
  0x1b   :  { %v58_v35 = vld [vmem:[%s2308_s0 + $0x150] sm:$0xff]  ;;  %v59_v37 = vld [vmem:[%s2308_s0 + $0x158] sm:$0xff]  ;;  %v32_v38 = vld [vmem:[%s2308_s0 + $0x80] sm:$0xff] }
  0x1c   :  { %1378 = vmatmul.mubr.msk.f32.gmra.mrb[8].mxu0 %vm72_vm1, %v25_v24  ;;  %1420 = vmatmul.mubr.msk.f32.gmra.mrb[8].mxu1 %vm72_vm1, %v53_v25  ;;  %v60_v39 = vld [vmem:[%s2308_s0 + $0x160] sm:$0xff]  ;;  %v33_v40 = vld [vmem:[%s2308_s0 + $0x88] sm:$0xff]  ;;  %v34_v42 = vld [vmem:[%s2308_s0 + $0x90] sm:$0xff]  ;;  %p1545_p3 = por %p1544_p2, %p1543_p1 }
  0x1d   :  { %1380 = vmatprep.mubr.msk.f32.mxu0 %vm72_vm1, %v26_v26  ;;  %1422 = vmatprep.mubr.msk.f32.mxu1 %vm72_vm1, %v54_v27  ;;  %v61_v41 = vld [vmem:[%s2308_s0 + $0x168] sm:$0xff]  ;;  %v62_v43 = vld [vmem:[%s2308_s0 + $0x170] sm:$0xff]  ;;  %v35_v44 = vld [vmem:[%s2308_s0 + $0x98] sm:$0xff] }
  0x1e   :  { %v63_v45 = vld [vmem:[%s2308_s0 + $0x178] sm:$0xff]  ;;  %v36_v46 = vld [vmem:[%s2308_s0 + $0xa0] sm:$0xff]  ;;  %v37_v48 = vld [vmem:[%s2308_s0 + $0xa8] sm:$0xff]  ;;  %p1546_p4 = pnand %p1545_p3, %p1539_p0 }
  0x1f   :  { %v64_v47 = vld [vmem:[%s2308_s0 + $0x180] sm:$0xff]  ;;  %v65_v49 = vld [vmem:[%s2308_s0 + $0x188] sm:$0xff]  ;;  %v38_v50 = vld [vmem:[%s2308_s0 + $0xb0] sm:$0xff] }
  0x20   :  { %1381 = vmatmul.mubr.msk.f32.gmra.mrb[10].mxu0 %vm72_vm1, %v27_v28  ;;  %1423 = vmatmul.mubr.msk.f32.gmra.mrb[10].mxu1 %vm72_vm1, %v55_v29  ;;  %v66_v51 = vld [vmem:[%s2308_s0 + $0x190] sm:$0xff]  ;;  %v39_v52 = vld [vmem:[%s2308_s0 + $0xb8] sm:$0xff]  ;;  %v40_v54 = vld [vmem:[%s2308_s0 + $0xc0] sm:$0xff] }
  0x21   :  { %1383 = vmatprep.mubr.msk.f32.mxu0 %vm72_vm1, %v28_v30  ;;  %1425 = vmatprep.mubr.msk.f32.mxu1 %vm72_vm1, %v56_v31  ;;  %v67_v53 = vld [vmem:[%s2308_s0 + $0x198] sm:$0xff]  ;;  %v68_v55 = vld [vmem:[%s2308_s0 + $0x1a0] sm:$0xff]  ;;  %v41_v56 = vld [vmem:[%s2308_s0 + $0xc8] sm:$0xff] }
  0x22   :  { %v69_v57 = vld [vmem:[%s2308_s0 + $0x1a8] sm:$0xff]  ;;  %v42_v58 = vld [vmem:[%s2308_s0 + $0xd0] sm:$0xff]  ;;  %v43_v60 = vld [vmem:[%s2308_s0 + $0xd8] sm:$0xff] }
  0x23   :  { %v70_v59 = vld [vmem:[%s2308_s0 + $0x1b0] sm:$0xff]  ;;  %v71_v61 = vld [vmem:[%s2308_s0 + $0x1b8] sm:$0xff] }
  0x24   :  { %1384 = vmatmul.mubr.msk.f32.gmra.mrb[12].mxu0 %vm72_vm1, %v29_v32  ;;  %1426 = vmatmul.mubr.msk.f32.gmra.mrb[12].mxu1 %vm72_vm1, %v57_v33 }
  0x25   :  { %1386 = vmatprep.mubr.msk.f32.mxu0 %vm72_vm1, %v30_v34  ;;  %1428 = vmatprep.mubr.msk.f32.mxu1 %vm72_vm1, %v58_v35 }
  0x28   :  { %1387 = vmatmul.mubr.msk.f32.gmra.mrb[14].mxu0 %vm72_vm1, %v31_v36  ;;  %1429 = vmatmul.mubr.msk.f32.gmra.mrb[14].mxu1 %vm72_vm1, %v59_v37 }
  0x29   :  { %1389 = vmatprep.mubr.msk.f32.mxu0 %vm72_vm1, %v32_v38  ;;  %1431 = vmatprep.mubr.msk.f32.mxu1 %vm72_vm1, %v60_v39 }
  0x2c   :  { %1390 = vmatmul.mubr.msk.f32.gmra.mrb[16].mxu0 %vm72_vm1, %v33_v40  ;;  %1432 = vmatmul.mubr.msk.f32.gmra.mrb[16].mxu1 %vm72_vm1, %v61_v41 }
  0x2d   :  { %1392 = vmatprep.mubr.msk.f32.mxu0 %vm72_vm1, %v34_v42  ;;  %1434 = vmatprep.mubr.msk.f32.mxu1 %vm72_vm1, %v62_v43 }
  0x30   :  { %1393 = vmatmul.mubr.msk.f32.gmra.mrb[18].mxu0 %vm72_vm1, %v35_v44  ;;  %1435 = vmatmul.mubr.msk.f32.gmra.mrb[18].mxu1 %vm72_vm1, %v63_v45 }
  0x31   :  { %1395 = vmatprep.mubr.msk.f32.mxu0 %vm72_vm1, %v36_v46  ;;  %1437 = vmatprep.mubr.msk.f32.mxu1 %vm72_vm1, %v64_v47 }
  0x34   :  { %1396 = vmatmul.mubr.msk.f32.gmra.mrb[20].mxu0 %vm72_vm1, %v37_v48  ;;  %1438 = vmatmul.mubr.msk.f32.gmra.mrb[20].mxu1 %vm72_vm1, %v65_v49 }
  0x35   :  { %1398 = vmatprep.mubr.msk.f32.mxu0 %vm72_vm1, %v38_v50  ;;  %1440 = vmatprep.mubr.msk.f32.mxu1 %vm72_vm1, %v66_v51 }
  0x38   :  { %1399 = vmatmul.mubr.msk.f32.gmra.mrb[22].mxu0 %vm72_vm1, %v39_v52  ;;  %1441 = vmatmul.mubr.msk.f32.gmra.mrb[22].mxu1 %vm72_vm1, %v67_v53 }
  0x39   :  { %1401 = vmatprep.mubr.msk.f32.mxu0 %vm72_vm1, %v40_v54  ;;  %1443 = vmatprep.mubr.msk.f32.mxu1 %vm72_vm1, %v68_v55 }
  0x3c   :  { %1402 = vmatmul.mubr.msk.f32.gmra.mrb[24].mxu0 %vm72_vm1, %v41_v56  ;;  %1444 = vmatmul.mubr.msk.f32.gmra.mrb[24].mxu1 %vm72_vm1, %v69_v57 }
  0x3d   :  { %1404 = vmatprep.mubr.msk.f32.mxu0 %vm72_vm1, %v42_v58  ;;  %1446 = vmatprep.mubr.msk.f32.mxu1 %vm72_vm1, %v70_v59 }
  0x40   :  { %1405 = vmatmul.mubr.msk.f32.gmra.mrb[26].mxu0 %vm72_vm1, %v43_v60  ;;  %1447 = vmatmul.mubr.msk.f32.gmra.mrb[26].mxu1 %vm72_vm1, %v71_v61 }
  0xdf   :  { %v1367_v0 = vpop.f32.mrb[0].mxu0  ;;  %v1409_v1 = vpop.f32.mrb[0].mxu1 }
  0xe0   :  { %v311_v2 = vpop.f32.mrb[1].mxu0  ;;  %v451_v3 = vpop.f32.mrb[1].mxu1  ;;  %v591_v30 = vmax.f32 %v1367_v0, 0.0  ;;  %v619_v31 = vmax.f32 %v1409_v1, 0.0 }
  0xe1   :  { %v590_v36 = vmax.f32 %v311_v2, 0.0  ;;  %v618_v37 = vmax.f32 %v451_v3, 0.0 }
  0xe3   :  { %v1370_v4 = vpop.f32.mrb[2].mxu0  ;;  %v1412_v5 = vpop.f32.mrb[2].mxu1 }
  0xe4   :  { %v321_v6 = vpop.f32.mrb[3].mxu0  ;;  %v461_v7 = vpop.f32.mrb[3].mxu1  ;;  %v593_v42 = vmax.f32 %v1370_v4, 0.0  ;;  %v621_v43 = vmax.f32 %v1412_v5, 0.0 }
  0xe5   :  { %v592_v48 = vmax.f32 %v321_v6, 0.0  ;;  %v620_v54 = vmax.f32 %v461_v7, 0.0 }
  0xe7   :  { %v1823_v8 = vpop.f32.mrb[4].mxu0  ;;  %v1825_v9 = vpop.f32.mrb[4].mxu1 }
  0xe8   :  { %v1827_v10 = vpop.f32.mrb[5].mxu0  ;;  %v1829_v11 = vpop.f32.mrb[5].mxu1  ;;  %v595_v60 = vmax.f32 %v1823_v8, 0.0  ;;  %v623_v61 = vmax.f32 %v1825_v9, 0.0 }
  0xe9   :  { %v594_v4 = vmax.f32 %v1827_v10, 0.0 }
  0xeb   :  { %v1831_v12 = vpop.f32.mrb[6].mxu0  ;;  %v1833_v13 = vpop.f32.mrb[6].mxu1 }
  0xec   :  { %v1835_v14 = vpop.f32.mrb[7].mxu0  ;;  %v1837_v15 = vpop.f32.mrb[7].mxu1  ;;  %v597_v10 = vmax.f32 %v1831_v12, 0.0 }
  0xed   :  { %v624_v12 = vmax.f32 %v1837_v15, 0.0 }
  0xef   :  { %v1839_v16 = vpop.f32.mrb[8].mxu0  ;;  %v1841_v17 = vpop.f32.mrb[8].mxu1 }
  0xf0   :  { %v1843_v18 = vpop.f32.mrb[9].mxu0  ;;  %v1845_v19 = vpop.f32.mrb[9].mxu1 }
  0xf1   :  { %v598_v15 = vmax.f32 %v1843_v18, 0.0 }
  0xf3   :  { %v1847_v20 = vpop.f32.mrb[10].mxu0  ;;  %v1849_v21 = vpop.f32.mrb[10].mxu1 }
  0xf4   :  { %v1851_v22 = vpop.f32.mrb[11].mxu0  ;;  %v1853_v23 = vpop.f32.mrb[11].mxu1  ;;  %v601_v18 = vmax.f32 %v1847_v20, 0.0 }
  0xf5   :  { %v628_v20 = vmax.f32 %v1853_v23, 0.0 }
  0xf7   :  { %v1855_v24 = vpop.f32.mrb[12].mxu0  ;;  %v1857_v25 = vpop.f32.mrb[12].mxu1 }
  0xf8   :  { %v1859_v26 = vpop.f32.mrb[13].mxu0  ;;  %v1861_v27 = vpop.f32.mrb[13].mxu1 }
  0xf9   :  { %v602_v23 = vmax.f32 %v1859_v26, 0.0 }
  0xfb   :  { %v1388_v28 = vpop.f32.mrb[14].mxu0  ;;  %v1430_v29 = vpop.f32.mrb[14].mxu1 }
  0xfc   :  { %v605_v32 = vmax.f32 %v1388_v28, 0.0  ;;  %v633_v33 = vmax.f32 %v1430_v29, 0.0  ;;  %v381_v34 = vpop.f32.mrb[15].mxu0  ;;  %v521_v35 = vpop.f32.mrb[15].mxu1 }
  0xfd   :  { %v604_v38 = vmax.f32 %v381_v34, 0.0  ;;  %v632_v39 = vmax.f32 %v521_v35, 0.0  ;;  %v1565_v34 = vmov 3   ;;  %v1566_v35 = vmov 2  }
  0xfe   :  { %v647_v40 = vmax.f32 %v591_v30, %v605_v32  ;;  %v661_v41 = vmax.f32 %v619_v31, %v633_v33  ;;  %v622_v30 = vmax.f32 %v1829_v11, 0.0 }
  0xff   :  { %v646_v44 = vmax.f32 %v590_v36, %v604_v38  ;;  %v660_v45 = vmax.f32 %v618_v37, %v632_v39  ;;  %v1391_v46 = vpop.f32.mrb[16].mxu0  ;;  %v1433_v47 = vpop.f32.mrb[16].mxu1  ;;  %v625_v36 = vmax.f32 %v1833_v13, 0.0 }
 0x100   :  { %v1863_v49 = vmax.f32 %v647_v40, %v661_v41  ;;  %v607_v50 = vmax.f32 %v1391_v46, 0.0  ;;  %v635_v51 = vmax.f32 %v1433_v47, 0.0  ;;  %v391_v52 = vpop.f32.mrb[17].mxu0  ;;  %v531_v53 = vpop.f32.mrb[17].mxu1  ;;  %v596_v40 = vmax.f32 %v1835_v14, 0.0 }
 0x101   :  { %v1865_v55 = vmax.f32 %v646_v44, %v660_v45  ;;  %v606_v56 = vmax.f32 %v391_v52, 0.0  ;;  %v634_v57 = vmax.f32 %v531_v53, 0.0  ;;  %v627_v52 = vmax.f32 %v1841_v17, 0.0 }
 0x102   :  { %v649_v58 = vmax.f32 %v593_v42, %v607_v50  ;;  %v663_v59 = vmax.f32 %v621_v43, %v635_v51  ;;  %805 = vperm.xlu1 %1471, %v1863_v49   ;;  %709 = vperm.xlu0 %1470, %v1863_v49   ;;  %v599_v51 = vmax.f32 %v1839_v16, 0.0  ;;  %v626_v17 = vmax.f32 %v1845_v19, 0.0 }
 0x103   :  { %v648_v0 = vmax.f32 %v592_v48, %v606_v56  ;;  %v662_v1 = vmax.f32 %v620_v54, %v634_v57  ;;  %v1394_v2 = vpop.f32.mrb[18].mxu0  ;;  %v1436_v3 = vpop.f32.mrb[18].mxu1  ;;  %v1567_v56 = vmov 4  }
 0x104   :  { %v1872_v5 = vmax.f32 %v649_v58, %v663_v59  ;;  %v609_v6 = vmax.f32 %v1394_v2, 0.0  ;;  %v637_v7 = vmax.f32 %v1436_v3, 0.0  ;;  %v401_v28 = vpop.f32.mrb[19].mxu0  ;;  %v541_v29 = vpop.f32.mrb[19].mxu1 }
 0x105   :  { %v1875_v31 = vmax.f32 %v648_v0, %v662_v1  ;;  %v608_v32 = vmax.f32 %v401_v28, 0.0  ;;  %v636_v8 = vmax.f32 %v541_v29, 0.0 }
 0x106   :  { %v651_v33 = vmax.f32 %v595_v60, %v609_v6  ;;  %v665_v9 = vmax.f32 %v623_v61, %v637_v7  ;;  %1473 = vset.pattern.permute.xlu1 %v1565_v34  ;;  %1472 = vset.pattern.permute.xlu0 %v1566_v35  ;;  %v629_v6 = vmax.f32 %v1849_v21, 0.0 }
 0x107   :  { %v650_v37 = vmax.f32 %v594_v4, %v608_v32  ;;  %v664_v38 = vmax.f32 %v622_v30, %v636_v8  ;;  %v1439_v39 = vpop.f32.mrb[20].mxu1  ;;  %1001 = vperm.xlu1 %1473, %v1863_v49   ;;  %903 = vperm.xlu0 %1472, %v1863_v49   ;;  %v1397_v11 = vpop.f32.mrb[20].mxu0 }
 0x108   :  { %v1884_v41 = vmax.f32 %v651_v33, %v665_v9  ;;  %v639_v42 = vmax.f32 %v1439_v39, 0.0  ;;  %v611_v43 = vmax.f32 %v1397_v11, 0.0  ;;  %v411_v44 = vpop.f32.mrb[21].mxu0  ;;  %v551_v45 = vpop.f32.mrb[21].mxu1  ;;  %v631_v39 = vmax.f32 %v1857_v25, 0.0 }
 0x109   :  { %v1887_v46 = vmax.f32 %v650_v37, %v664_v38  ;;  %v610_v13 = vmax.f32 %v411_v44, 0.0  ;;  %v638_v47 = vmax.f32 %v551_v45, 0.0  ;;  %v603_v38 = vmax.f32 %v1855_v24, 0.0 }
 0x10a   :  { %v667_v48 = vmax.f32 %v625_v36, %v639_v42  ;;  %v653_v50 = vmax.f32 %v597_v10, %v611_v43 }
 0x10b   :  { %v652_v53 = vmax.f32 %v596_v40, %v610_v13  ;;  %v666_v14 = vmax.f32 %v624_v12, %v638_v47  ;;  %v1442_v54 = vpop.f32.mrb[22].mxu1  ;;  %1477 = vset.pattern.permute.xlu1 %v1566_v35  ;;  %1474 = vset.pattern.permute.xlu0 %v1567_v56  ;;  %v1400_v57 = vpop.f32.mrb[22].mxu0 }
 0x10c   :  { %v1894_v58 = vmax.f32 %v653_v50, %v667_v48  ;;  %v641_v59 = vmax.f32 %v1442_v54, 0.0  ;;  %v613_v60 = vmax.f32 %v1400_v57, 0.0  ;;  %v561_v61 = vpop.f32.mrb[23].mxu1  ;;  %1099 = vperm.xlu0 %1474, %v1863_v49   ;;  %899 = vperm.xlu1 %1477, %v1865_v55   ;;  %v421_v16 = vpop.f32.mrb[23].mxu0  ;;  %v600_v49 = vmax.f32 %v1851_v22, 0.0 }
 0x10d   :  { %v1899_v0 = vmax.f32 %v652_v53, %v666_v14  ;;  %v640_v1 = vmax.f32 %v561_v61, 0.0  ;;  %v612_v2 = vmax.f32 %v421_v16, 0.0  ;;  %v630_v48 = vmax.f32 %v1861_v27, 0.0  ;;  %v787_v27 = vld [vmem:[%s2309_s1 + $0x98] sm:$0xff] }
 0x10e   :  { %v669_v3 = vmax.f32 %v627_v52, %v641_v59  ;;  %v655_v4 = vmax.f32 %v599_v51, %v613_v60  ;;  %v983_v59 = vld [vmem:[%s2309_s1 + $0x178] sm:$0xff] }
 0x10f   :  { %v668_v7 = vmax.f32 %v626_v17, %v640_v1  ;;  %v654_v28 = vmax.f32 %v598_v15, %v612_v2  ;;  %v1403_v29 = vpop.f32.mrb[24].mxu0  ;;  %v1445_v30 = vpop.f32.mrb[24].mxu1  ;;  %v1081_v2 = vld [vmem:[%s2309_s1 + $0x1e8] sm:$0xff] }
 0x110   :  { %v1904_v32 = vmax.f32 %v655_v4, %v669_v3  ;;  %v615_v8 = vmax.f32 %v1403_v29, 0.0  ;;  %v643_v19 = vmax.f32 %v1445_v30, 0.0  ;;  %v571_v33 = vpop.f32.mrb[25].mxu1  ;;  %1475 = vset.pattern.permute.xlu0 %v1564_v63  ;;  %1479 = vset.pattern.permute.xlu1 %v1567_v56  ;;  %v431_v9 = vpop.f32.mrb[25].mxu0  ;;  %v688_v30 = vld [vmem:[%s2309_s1 + $0x20] sm:$0xff] }
 0x111   :  { %v1909_v10 = vmax.f32 %v654_v28, %v668_v7  ;;  %v642_v21 = vmax.f32 %v571_v33, 0.0  ;;  %v614_v36 = vmax.f32 %v431_v9, 0.0  ;;  %1095 = vperm.xlu1 %1479, %v1865_v55   ;;  %704 = vperm.xlu0 %1475, %v1865_v55  }
 0x112   :  { %v657_v22 = vmax.f32 %v601_v18, %v615_v8  ;;  %v671_v37 = vmax.f32 %v629_v6, %v643_v19 }
 0x113   :  { %v670_v11 = vmax.f32 %v628_v20, %v642_v21  ;;  %v656_v40 = vmax.f32 %v600_v49, %v614_v36  ;;  %v1406_v42 = vpop.f32.mrb[26].mxu0  ;;  %v1448_v43 = vpop.f32.mrb[26].mxu1  ;;  %v786_v49 = vld [vmem:[%s2309_s1 + $0x90] sm:$0xff]  ;;  %v1080_v36 = vld [vmem:[%s2309_s1 + $0x1e0] sm:$0xff] }
 0x114   :  { %v1916_v44 = vmax.f32 %v657_v22, %v671_v37  ;;  %v617_v45 = vmax.f32 %v1406_v42, 0.0  ;;  %v645_v12 = vmax.f32 %v1448_v43, 0.0  ;;  %v441_v13 = vpop.f32.mrb[27].mxu0  ;;  %v581_v47 = vpop.f32.mrb[27].mxu1  ;;  %v982_v21 = vld [vmem:[%s2309_s1 + $0x170] sm:$0xff]  ;;  %v789_v43 = vld [vmem:[%s2309_s1 + $0xa8] sm:$0xff] }
 0x115   :  { %v1919_v50 = vmax.f32 %v656_v40, %v670_v11  ;;  %v616_v51 = vmax.f32 %v441_v13, 0.0  ;;  %v644_v24 = vmax.f32 %v581_v47, 0.0  ;;  %1480 = vset.pattern.permute.xlu1 %v1564_v63  ;;  %1476 = vset.pattern.permute.xlu0 %v1563_v62  ;;  %v691_v40 = vld [vmem:[%s2309_s1 + $0x38] sm:$0xff] }
 0x116   :  { %v659_v25 = vmax.f32 %v603_v38, %v617_v45  ;;  %v673_v52 = vmax.f32 %v631_v39, %v645_v12  ;;  %801 = vperm.xlu0 %1476, %v1865_v55   ;;  %719 = vperm.xlu1 %1480, %v1872_v5  }
 0x117   :  { %v658_v26 = vmax.f32 %v602_v23, %v616_v51  ;;  %v672_v53 = vmax.f32 %v630_v48, %v644_v24 }
 0x118   :  { %v1925_v14 = vmax.f32 %v659_v25, %v673_v52  ;;  %v690_v25 = vld [vmem:[%s2309_s1 + $0x30] sm:$0xff]  ;;  %v985_v52 = vld [vmem:[%s2309_s1 + $0x188] sm:$0xff] }
 0x119   :  { %v1927_v54 = vmax.f32 %v658_v26, %v672_v53  ;;  %v788_v26 = vld [vmem:[%s2309_s1 + $0xa0] sm:$0xff] }
 0x11a   :  { %1478 = vset.pattern.permute.xlu0 %v1565_v34  ;;  %1482 = vset.pattern.permute.xlu1 %v1566_v35 }
 0x11b   :  { %997 = vperm.xlu0 %1478, %v1865_v55   ;;  %911 = vperm.xlu1 %1482, %v1872_v5   ;;  %v689_v55 = vld [vmem:[%s2309_s1 + $0x28] sm:$0xff] }
 0x11f   :  { %1481 = vset.pattern.permute.xlu0 %v1563_v62  ;;  %1485 = vset.pattern.permute.xlu1 %v1564_v63 }
 0x120   :  { %813 = vperm.xlu0 %1481, %v1872_v5   ;;  %714 = vperm.xlu1 %1485, %v1875_v31  }
 0x124   :  { %1483 = vset.pattern.permute.xlu0 %v1565_v34  ;;  %1486 = vset.pattern.permute.xlu1 %v1563_v62 }
 0x125   :  { %1009 = vperm.xlu0 %1483, %v1872_v5   ;;  %809 = vperm.xlu1 %1486, %v1875_v31  }
 0x129   :  { %1484 = vset.pattern.permute.xlu0 %v1567_v56  ;;  %1487 = vset.pattern.permute.xlu1 %v1566_v35 }
 0x12a   :  { %1107 = vperm.xlu0 %1484, %v1872_v5   ;;  %907 = vperm.xlu1 %1487, %v1875_v31  }
 0x12e   :  { %1491 = vset.pattern.permute.xlu0 %v1563_v62  ;;  %1488 = vset.pattern.permute.xlu1 %v1565_v34 }
 0x12f   :  { %1005 = vperm.xlu1 %1488, %v1875_v31   ;;  %821 = vperm.xlu0 %1491, %v1884_v41  }
 0x133   :  { %1489 = vset.pattern.permute.xlu1 %v1567_v56  ;;  %1493 = vset.pattern.permute.xlu0 %v1565_v34 }
 0x134   :  { %1103 = vperm.xlu1 %1489, %v1875_v31   ;;  %1017 = vperm.xlu0 %1493, %v1884_v41  }
 0x138   :  { %1490 = vset.pattern.permute.xlu1 %v1564_v63  ;;  %1494 = vset.pattern.permute.xlu0 %v1564_v63 }
 0x139   :  { %729 = vperm.xlu1 %1490, %v1884_v41   ;;  %724 = vperm.xlu0 %1494, %v1887_v46  }
 0x13d   :  { %1492 = vset.pattern.permute.xlu1 %v1566_v35  ;;  %1496 = vset.pattern.permute.xlu0 %v1566_v35 }
 0x13e   :  { %919 = vperm.xlu1 %1492, %v1884_v41   ;;  %915 = vperm.xlu0 %1496, %v1887_v46  }
 0x142   :  { %1495 = vset.pattern.permute.xlu1 %v1563_v62  ;;  %1500 = vset.pattern.permute.xlu0 %v1563_v62 }
 0x143   :  { %817 = vperm.xlu1 %1495, %v1887_v46   ;;  %829 = vperm.xlu0 %1500, %v1894_v58  }
 0x147   :  { %1497 = vset.pattern.permute.xlu1 %v1565_v34  ;;  %1502 = vset.pattern.permute.xlu0 %v1565_v34 }
 0x148   :  { %1013 = vperm.xlu1 %1497, %v1887_v46   ;;  %1025 = vperm.xlu0 %1502, %v1894_v58  }
 0x14c   :  { %1498 = vset.pattern.permute.xlu1 %v1567_v56  ;;  %1504 = vset.pattern.permute.xlu0 %v1564_v63 }
 0x14d   :  { %1111 = vperm.xlu1 %1498, %v1887_v46   ;;  %734 = vperm.xlu0 %1504, %v1899_v0  }
 0x151   :  { %1499 = vset.pattern.permute.xlu1 %v1564_v63  ;;  %1506 = vset.pattern.permute.xlu0 %v1566_v35 }
 0x152   :  { %739 = vperm.xlu1 %1499, %v1894_v58   ;;  %923 = vperm.xlu0 %1506, %v1899_v0  }
 0x156   :  { %1501 = vset.pattern.permute.xlu1 %v1566_v35  ;;  %1509 = vset.pattern.permute.xlu0 %v1563_v62 }
 0x157   :  { %927 = vperm.xlu1 %1501, %v1894_v58   ;;  %837 = vperm.xlu0 %1509, %v1904_v32  }
 0x15b   :  { %1503 = vset.pattern.permute.xlu1 %v1567_v56  ;;  %1511 = vset.pattern.permute.xlu0 %v1565_v34 }
 0x15c   :  { %1123 = vperm.xlu1 %1503, %v1894_v58   ;;  %1033 = vperm.xlu0 %1511, %v1904_v32   ;;  %v885_v58 = vld [vmem:[%s2309_s1 + $0x108] sm:$0xff] }
 0x160   :  { %1505 = vset.pattern.permute.xlu1 %v1563_v62  ;;  %1513 = vset.pattern.permute.xlu0 %v1564_v63 }
 0x161   :  { %825 = vperm.xlu1 %1505, %v1899_v0   ;;  %744 = vperm.xlu0 %1513, %v1909_v10  }
 0x165   :  { %1507 = vset.pattern.permute.xlu1 %v1565_v34  ;;  %1515 = vset.pattern.permute.xlu0 %v1566_v35 }
 0x166   :  { %1021 = vperm.xlu1 %1507, %v1899_v0   ;;  %931 = vperm.xlu0 %1515, %v1909_v10  }
 0x16a   :  { %1508 = vset.pattern.permute.xlu1 %v1564_v63  ;;  %1517 = vset.pattern.permute.xlu0 %v1567_v56 }
 0x16b   :  { %749 = vperm.xlu1 %1508, %v1904_v32   ;;  %1127 = vperm.xlu0 %1517, %v1909_v10  }
 0x16f   :  { %1510 = vset.pattern.permute.xlu1 %v1566_v35  ;;  %1519 = vset.pattern.permute.xlu0 %v1563_v62 }
 0x170   :  { %935 = vperm.xlu1 %1510, %v1904_v32   ;;  %845 = vperm.xlu0 %1519, %v1916_v44  }
 0x174   :  { %1512 = vset.pattern.permute.xlu1 %v1567_v56  ;;  %1523 = vset.pattern.permute.xlu0 %v1564_v63 }
 0x175   :  { %1131 = vperm.xlu1 %1512, %v1904_v32   ;;  %754 = vperm.xlu0 %1523, %v1919_v50   ;;  %v884_v32 = vld [vmem:[%s2309_s1 + $0x100] sm:$0xff] }
 0x179   :  { %1514 = vset.pattern.permute.xlu1 %v1563_v62  ;;  %1525 = vset.pattern.permute.xlu0 %v1566_v35 }
 0x17a   :  { %833 = vperm.xlu1 %1514, %v1909_v10   ;;  %939 = vperm.xlu0 %1525, %v1919_v50  }
 0x17e   :  { %1516 = vset.pattern.permute.xlu1 %v1565_v34  ;;  %1527 = vset.pattern.permute.xlu0 %v1567_v56 }
 0x17f   :  { %1029 = vperm.xlu1 %1516, %v1909_v10   ;;  %1135 = vperm.xlu0 %1527, %v1919_v50  }
 0x181   :  { %v806_v5 = vpop.permute.xlu1 %805  ;;  %v710_v31 = vpop.permute.xlu0 %709 }
 0x182   :  { %v857_v46 = vmul.f32 %v806_v5, %v787_v27  ;;  %v773_v57 = vmul.f32 %v710_v31, %v689_v55 }
 0x183   :  { %1518 = vset.pattern.permute.xlu1 %v1564_v63  ;;  %1529 = vset.pattern.permute.xlu0 %v1563_v62 }
 0x184   :  { %v871_v15 = vadd.f32 %v857_v46, %v773_v57  ;;  %759 = vperm.xlu1 %1518, %v1916_v44   ;;  %853 = vperm.xlu0 %1529, %v1925_v14  }
 0x186   :  { %v1002_v60 = vpop.permute.xlu1 %1001  ;;  %v904_v61 = vpop.permute.xlu0 %903 }
 0x187   :  { %v955_v16 = vmul.f32 %v904_v61, %v885_v58  ;;  %v1053_v17 = vmul.f32 %v1002_v60, %v983_v59  ;;  %v1083_v58 = vld [vmem:[%s2309_s1 + $0x1f8] sm:$0xff]  ;;  %v886_v59 = vld [vmem:[%s2309_s1 + $0x110] sm:$0xff] }
 0x188   :  { %1520 = vset.pattern.permute.xlu1 %v1566_v35  ;;  %1532 = vset.pattern.permute.xlu0 %v1564_v63 }
 0x189   :  { %v969_v1 = vadd.f32 %v955_v16, %v871_v15  ;;  %943 = vperm.xlu1 %1520, %v1916_v44   ;;  %764 = vperm.xlu0 %1532, %v1927_v54  }
 0x18b   :  { %v1067_v3 = vadd.f32 %v1053_v17, %v969_v1  ;;  %v1100_v4 = vpop.permute.xlu0 %1099  ;;  %v900_v18 = vpop.permute.xlu1 %899 }
 0x18c   :  { %v1151_v6 = vmul.f32 %v1100_v4, %v1081_v2  ;;  %v954_v20 = vmul.f32 %v900_v18, %v884_v32  ;;  %v984_v2 = vld [vmem:[%s2309_s1 + $0x180] sm:$0xff] }
 0x18d   :  { %1521 = vset.pattern.permute.xlu1 %v1565_v34  ;;  %1534 = vset.pattern.permute.xlu0 %v1566_v35 }
 0x18e   :  { %v1165_v7 = vadd.f32 %v1151_v6, %v1067_v3  ;;  %1041 = vperm.xlu1 %1521, %v1916_v44   ;;  %947 = vperm.xlu0 %1534, %v1927_v54  }
 0x190   :  { %v1096_v28 = vpop.permute.xlu1 %1095  ;;  %v705_v29 = vpop.permute.xlu0 %704  ;;  %v1181_v48 = vsel %vm1179_vm4, %v1165_v7, 0.0  ;;  %v1082_v7 = vld [vmem:[%s2309_s1 + $0x1f0] sm:$0xff] }
 0x191   :  { %v772_v33 = vmul.f32 %v705_v29, %v688_v30  ;;  %v1150_v11 = vmul.f32 %v1096_v28, %v1080_v36  ;;  %v987_v36 = vld [vmem:[%s2309_s1 + $0x198] sm:$0xff] }
 0x192   :  { %1522 = vset.pattern.permute.xlu1 %v1567_v56  ;;  %1537 = vset.pattern.permute.xlu0 %v1567_v56 }
 0x193   :  { %1139 = vperm.xlu1 %1522, %v1916_v44   ;;  %1143 = vperm.xlu0 %1537, %v1927_v54   ;;  %v887_v44 = vld [vmem:[%s2309_s1 + $0x118] sm:$0xff] }
 0x195   :  { %v802_v8 = vpop.permute.xlu0 %801  ;;  %v720_v19 = vpop.permute.xlu1 %719 }
 0x196   :  { %v856_v9 = vmul.f32 %v802_v8, %v786_v49  ;;  %v775_v13 = vmul.f32 %v720_v19, %v691_v40 }
 0x197   :  { %1524 = vset.pattern.permute.xlu1 %v1563_v62  ;;  %1147 = vperm.xlu0 %1537, %v1925_v14  }
 0x198   :  { %v870_v10 = vadd.f32 %v856_v9, %v772_v33  ;;  %841 = vperm.xlu1 %1524, %v1919_v50  }
 0x19a   :  { %v968_v22 = vadd.f32 %v954_v20, %v870_v10  ;;  %v998_v37 = vpop.permute.xlu0 %997  ;;  %v912_v38 = vpop.permute.xlu1 %911 }
 0x19b   :  { %v1052_v39 = vmul.f32 %v998_v37, %v982_v21 }
 0x19c   :  { %1526 = vset.pattern.permute.xlu1 %v1565_v34 }
 0x19d   :  { %v1066_v42 = vadd.f32 %v1052_v39, %v968_v22  ;;  %1037 = vperm.xlu1 %1526, %v1919_v50   ;;  %v957_v50 = vmul.f32 %v912_v38, %v887_v44  ;;  %v790_v39 = vld [vmem:[%s2309_s1 + $0xb0] sm:$0xff] }
 0x19f   :  { %v1164_v23 = vadd.f32 %v1150_v11, %v1066_v42  ;;  %v814_v45 = vpop.permute.xlu0 %813  ;;  %v715_v12 = vpop.permute.xlu1 %714  ;;  %v888_v11 = vld [vmem:[%s2309_s1 + $0x120] sm:$0xff] }
 0x1a0   :  { %v859_v47 = vmul.f32 %v814_v45, %v789_v43  ;;  %v774_v5 = vmul.f32 %v715_v12, %v690_v25  ;;  %v986_v12 = vld [vmem:[%s2309_s1 + $0x190] sm:$0xff] }
 0x1a1   :  { %v1180_v51 = vsel %vm1179_vm4, %v1164_v23, 0.0  ;;  %1528 = vset.pattern.permute.xlu1 %v1564_v63 }
 0x1a2   :  { %v873_v24 = vadd.f32 %v859_v47, %v775_v13  ;;  %769 = vperm.xlu1 %1528, %v1925_v14   ;;  %v1182_v53 = vadd.f32 %v1181_v48, %v1180_v51 }
 0x1a4   :  { %v1010_v27 = vpop.permute.xlu0 %1009  ;;  %v971_v55 = vadd.f32 %v957_v50, %v873_v24  ;;  %v810_v63 = vpop.permute.xlu1 %809  ;;  %v1084_v50 = vld [vmem:[%s2309_s1 + $0x200] sm:$0xff] }
 0x1a5   :  { %v1055_v31 = vmul.f32 %v1010_v27, %v985_v52  ;;  %v858_v46 = vmul.f32 %v810_v63, %v788_v26  ;;  %v793_v63 = vld [vmem:[%s2309_s1 + $0xc8] sm:$0xff] }
 0x1a6   :  { %1530 = vset.pattern.permute.xlu1 %v1566_v35 }
 0x1a7   :  { %v1069_v57 = vadd.f32 %v1055_v31, %v971_v55  ;;  %v872_v15 = vadd.f32 %v858_v46, %v774_v5  ;;  %951 = vperm.xlu1 %1530, %v1925_v14  }
 0x1a9   :  { %v1108_v60 = vpop.permute.xlu0 %1107  ;;  %v908_v61 = vpop.permute.xlu1 %907 }
 0x1aa   :  { %v1153_v16 = vmul.f32 %v1108_v60, %v1083_v58  ;;  %v956_v17 = vmul.f32 %v908_v61, %v886_v59  ;;  %v989_v58 = vld [vmem:[%s2309_s1 + $0x1a8] sm:$0xff] }
 0x1ab   :  { %1531 = vset.pattern.permute.xlu1 %v1565_v34 }
 0x1ac   :  { %v1167_v1 = vadd.f32 %v1153_v16, %v1069_v57  ;;  %v970_v35 = vadd.f32 %v956_v17, %v872_v15  ;;  %1049 = vperm.xlu1 %1531, %v1925_v14   ;;  %v791_v14 = vld [vmem:[%s2309_s1 + $0xb8] sm:$0xff] }
 0x1ad   :  { %v891_v57 = vld [vmem:[%s2309_s1 + $0x138] sm:$0xff] }
 0x1ae   :  { %v1006_v3 = vpop.permute.xlu1 %1005  ;;  %v822_v18 = vpop.permute.xlu0 %821 }
 0x1af   :  { %v1054_v4 = vmul.f32 %v1006_v3, %v984_v2  ;;  %v861_v19 = vmul.f32 %v822_v18, %v791_v14  ;;  %v694_v18 = vld [vmem:[%s2309_s1 + $0x50] sm:$0xff] }
 0x1b0   :  { %1533 = vset.pattern.permute.xlu1 %v1563_v62  ;;  %v693_v62 = vld [vmem:[%s2309_s1 + $0x48] sm:$0xff] }
 0x1b1   :  { %v1068_v6 = vadd.f32 %v1054_v4, %v970_v35  ;;  %849 = vperm.xlu1 %1533, %v1927_v54  }
 0x1b3   :  { %v1104_v28 = vpop.permute.xlu1 %1103  ;;  %v1018_v49 = vpop.permute.xlu0 %1017 }
 0x1b4   :  { %v1152_v29 = vmul.f32 %v1104_v28, %v1082_v7  ;;  %v1057_v38 = vmul.f32 %v1018_v49, %v987_v36  ;;  %v792_v7 = vld [vmem:[%s2309_s1 + $0xc0] sm:$0xff]  ;;  %v890_v28 = vld [vmem:[%s2309_s1 + $0x130] sm:$0xff] }
 0x1b5   :  { %1535 = vset.pattern.permute.xlu1 %v1565_v34  ;;  %v1185_v34 = vsel %vm1179_vm4, %v1167_v1, 0.0  ;;  %v1087_v1 = vld [vmem:[%s2309_s1 + $0x218] sm:$0xff] }
 0x1b6   :  { %v1166_v30 = vadd.f32 %v1152_v29, %v1068_v6  ;;  %1045 = vperm.xlu1 %1535, %v1927_v54   ;;  %v889_v54 = vld [vmem:[%s2309_s1 + $0x128] sm:$0xff] }
 0x1b8   :  { %v1183_v32 = vsel %vm1179_vm4, %v1166_v30, 0.0  ;;  %v730_v8 = vpop.permute.xlu1 %729  ;;  %v725_v21 = vpop.permute.xlu0 %724 }
 0x1b9   :  { %v1184_v33 = vadd.f32 %v1183_v32, %v1182_v53  ;;  %v777_v9 = vmul.f32 %v730_v8, %v693_v62  ;;  %v695_v53 = vld [vmem:[%s2309_s1 + $0x58] sm:$0xff]  ;;  %v988_v8 = vld [vmem:[%s2309_s1 + $0x1a0] sm:$0xff] }
 0x1ba   :  { %1536 = vset.pattern.permute.xlu1 %v1567_v56  ;;  %v692_v56 = vld [vmem:[%s2309_s1 + $0x40] sm:$0xff] }
 0x1bb   :  { %v875_v20 = vadd.f32 %v861_v19, %v777_v9  ;;  %1115 = vperm.xlu1 %1536, %v1884_v41   ;;  %v1186_v10 = vadd.f32 %v1185_v34, %v1184_v33  ;;  %v776_v23 = vmul.f32 %v725_v21, %v692_v56 }
 0x1bd   :  { %v920_v22 = vpop.permute.xlu1 %919  ;;  %v916_v40 = vpop.permute.xlu0 %915 }
 0x1be   :  { %v959_v37 = vmul.f32 %v920_v22, %v889_v54  ;;  %v958_v44 = vmul.f32 %v916_v40, %v888_v11 }
 0x1bf   :  { %1119 = vperm.xlu1 %1536, %v1899_v0  }
 0x1c0   :  { %v973_v41 = vadd.f32 %v959_v37, %v875_v20 }
 0x1c2   :  { %v818_v42 = vpop.permute.xlu1 %817  ;;  %v2132_v43 = vadd.f32 %v1057_v38, %v973_v41  ;;  %v830_v52 = vpop.permute.xlu0 %829 }
 0x1c3   :  { %v860_v0 = vmul.f32 %v818_v42, %v790_v39  ;;  %v863_v15 = vmul.f32 %v830_v52, %v793_v63  ;;  %v796_v52 = vld [vmem:[%s2309_s1 + $0xe0] sm:$0xff]  ;;  %v795_v63 = vld [vmem:[%s2309_s1 + $0xd8] sm:$0xff] }
 0x1c5   :  { %v874_v45 = vadd.f32 %v860_v0, %v776_v23 }
 0x1c7   :  { %v1014_v13 = vpop.permute.xlu1 %1013  ;;  %v972_v47 = vadd.f32 %v958_v44, %v874_v45  ;;  %v1026_v46 = vpop.permute.xlu0 %1025  ;;  %v794_v45 = vld [vmem:[%s2309_s1 + $0xd0] sm:$0xff] }
 0x1c8   :  { %v1056_v48 = vmul.f32 %v1014_v13, %v986_v12  ;;  %v1059_v16 = vmul.f32 %v1026_v46, %v989_v58  ;;  %v893_v46 = vld [vmem:[%s2309_s1 + $0x148] sm:$0xff] }
 0x1ca   :  { %v1070_v51 = vadd.f32 %v1056_v48, %v972_v47  ;;  %v696_v47 = vld [vmem:[%s2309_s1 + $0x60] sm:$0xff] }
 0x1cc   :  { %v1112_v24 = vpop.permute.xlu1 %1111  ;;  %v735_v35 = vpop.permute.xlu0 %734 }
 0x1cd   :  { %v1154_v25 = vmul.f32 %v1112_v24, %v1084_v50  ;;  %v778_v30 = vmul.f32 %v735_v35, %v694_v18  ;;  %v892_v24 = vld [vmem:[%s2309_s1 + $0x140] sm:$0xff] }
 0x1ce   :  { %v992_v18 = vld [vmem:[%s2309_s1 + $0x1c0] sm:$0xff] }
 0x1cf   :  { %v1168_v26 = vadd.f32 %v1154_v25, %v1070_v51 }
 0x1d1   :  { %v1187_v27 = vsel %vm1179_vm4, %v1168_v26, 0.0  ;;  %v740_v55 = vpop.permute.xlu1 %739  ;;  %v924_v29 = vpop.permute.xlu0 %923  ;;  %v697_v26 = vld [vmem:[%s2309_s1 + $0x68] sm:$0xff] }
 0x1d2   :  { %v2147_v5 = vadd.f32 %v1187_v27, %v1186_v10  ;;  %v779_v31 = vmul.f32 %v740_v55, %v695_v53  ;;  %v960_v62 = vmul.f32 %v924_v29, %v890_v28  ;;  %v698_v27 = vld [vmem:[%s2309_s1 + $0x70] sm:$0xff] }
 0x1d3   :  { %v990_v55 = vld [vmem:[%s2309_s1 + $0x1b0] sm:$0xff] }
 0x1d4   :  { %v877_v60 = vadd.f32 %v863_v15, %v779_v31 }
 0x1d6   :  { %v928_v59 = vpop.permute.xlu1 %927  ;;  %v838_v34 = vpop.permute.xlu0 %837 }
 0x1d7   :  { %v961_v61 = vmul.f32 %v928_v59, %v891_v57 }
 0x1d9   :  { %v975_v17 = vadd.f32 %v961_v61, %v877_v60 }
 0x1db   :  { %v1073_v2 = vadd.f32 %v1059_v16, %v975_v17  ;;  %v1124_v3 = vpop.permute.xlu1 %1123  ;;  %v1034_v10 = vpop.permute.xlu0 %1033  ;;  %v865_v16 = vmul.f32 %v838_v34, %v795_v63  ;;  %v797_v34 = vld [vmem:[%s2309_s1 + $0xe8] sm:$0xff]  ;;  %v896_v63 = vld [vmem:[%s2309_s1 + $0x160] sm:$0xff] }
 0x1dc   :  { %v1157_v4 = vmul.f32 %v1124_v3, %v1087_v1  ;;  %v894_v1 = vld [vmem:[%s2309_s1 + $0x150] sm:$0xff] }
 0x1de   :  { %v2161_v6 = vadd.f32 %v1157_v4, %v1073_v2  ;;  %v1088_v4 = vld [vmem:[%s2309_s1 + $0x220] sm:$0xff] }
 0x1e0   :  { %v826_v14 = vpop.permute.xlu1 %825  ;;  %v745_v36 = vpop.permute.xlu0 %744 }
 0x1e1   :  { %v862_v49 = vmul.f32 %v826_v14, %v792_v7  ;;  %v780_v51 = vmul.f32 %v745_v36, %v696_v47  ;;  %v991_v7 = vld [vmem:[%s2309_s1 + $0x1b8] sm:$0xff] }
 0x1e3   :  { %v876_v32 = vadd.f32 %v862_v49, %v778_v30 }
 0x1e5   :  { %v1022_v19 = vpop.permute.xlu1 %1021  ;;  %v974_v33 = vadd.f32 %v960_v62, %v876_v32  ;;  %v932_v37 = vpop.permute.xlu0 %931  ;;  %v1089_v62 = vld [vmem:[%s2309_s1 + $0x228] sm:$0xff] }
 0x1e6   :  { %v1058_v9 = vmul.f32 %v1022_v19, %v988_v8  ;;  %v962_v31 = vmul.f32 %v932_v37, %v892_v24  ;;  %v1061_v19 = vmul.f32 %v1034_v10, %v991_v7  ;;  %v1090_v37 = vld [vmem:[%s2309_s1 + $0x230] sm:$0xff]  ;;  %v895_v10 = vld [vmem:[%s2309_s1 + $0x158] sm:$0xff]  ;;  %v1200_v24 = vsel %vm1179_vm4, %v2161_v6, 0.0 }
 0x1e8   :  { %v2172_v20 = vadd.f32 %v1058_v9, %v974_v33  ;;  %v699_v33 = vld [vmem:[%s2309_s1 + $0x78] sm:$0xff] }
 0x1ea   :  { %v750_v54 = vpop.permute.xlu1 %749  ;;  %v1128_v41 = vpop.permute.xlu0 %1127 }
 0x1eb   :  { %v781_v15 = vmul.f32 %v750_v54, %v697_v26  ;;  %v1158_v49 = vmul.f32 %v1128_v41, %v1088_v4 }
 0x1ed   :  { %v879_v3 = vadd.f32 %v865_v16, %v781_v15 }
 0x1ef   :  { %v936_v21 = vpop.permute.xlu1 %935  ;;  %v846_v11 = vpop.permute.xlu0 %845 }
 0x1f0   :  { %v963_v17 = vmul.f32 %v936_v21, %v893_v46 }
 0x1f2   :  { %v977_v30 = vadd.f32 %v963_v17, %v879_v3 }
 0x1f4   :  { %v1132_v22 = vpop.permute.xlu1 %1131  ;;  %v755_v42 = vpop.permute.xlu0 %754  ;;  %v1075_v21 = vadd.f32 %v1061_v19, %v977_v30 }
 0x1f5   :  { %v782_v59 = vmul.f32 %v755_v42, %v698_v27  ;;  %v1159_v36 = vmul.f32 %v1132_v22, %v1089_v62  ;;  %v799_v42 = vld [vmem:[%s2309_s1 + $0xf8] sm:$0xff]  ;;  %v867_v22 = vmul.f32 %v846_v11, %v797_v34  ;;  %v798_v11 = vld [vmem:[%s2309_s1 + $0xf0] sm:$0xff] }
 0x1f9   :  { %v834_v38 = vpop.permute.xlu1 %833  ;;  %v940_v0 = vpop.permute.xlu0 %939 }
 0x1fa   :  { %v864_v48 = vmul.f32 %v834_v38, %v794_v45  ;;  %v964_v28 = vmul.f32 %v940_v0, %v894_v1  ;;  %v701_v38 = vld [vmem:[%s2309_s1 + $0x88] sm:$0xff] }
 0x1fb   :  { %v993_v45 = vld [vmem:[%s2309_s1 + $0x1c8] sm:$0xff] }
 0x1fc   :  { %v878_v53 = vadd.f32 %v864_v48, %v780_v51 }
 0x1fe   :  { %v1030_v56 = vpop.permute.xlu1 %1029  ;;  %v1136_v12 = vpop.permute.xlu0 %1135  ;;  %v976_v60 = vadd.f32 %v962_v31, %v878_v53 }
 0x1ff   :  { %v1060_v61 = vmul.f32 %v1030_v56, %v990_v55  ;;  %v1160_v48 = vmul.f32 %v1136_v12, %v1090_v37  ;;  %v1091_v12 = vld [vmem:[%s2309_s1 + $0x238] sm:$0xff] }
 0x201   :  { %v1074_v29 = vadd.f32 %v1060_v61, %v976_v60 }
 0x203   :  { %v760_v39 = vpop.permute.xlu1 %759  ;;  %v854_v25 = vpop.permute.xlu0 %853  ;;  %v1172_v54 = vadd.f32 %v1158_v49, %v1074_v29 }
 0x204   :  { %v783_v41 = vmul.f32 %v760_v39, %v699_v33  ;;  %v700_v39 = vld [vmem:[%s2309_s1 + $0x80] sm:$0xff]  ;;  %v869_v26 = vmul.f32 %v854_v25, %v799_v42  ;;  %v1085_v33 = vld [vmem:[%s2309_s1 + $0x208] sm:$0xff] }
 0x205   :  { %v1201_v47 = vsel %vm1179_vm4, %v1172_v54, 0.0 }
 0x206   :  { %v881_v27 = vadd.f32 %v867_v22, %v783_v41  ;;  %v1202_v25 = vadd.f32 %v1201_v47, %v1200_v24 }
 0x208   :  { %v2174_v40 = vpop.permute.xlu1 %943  ;;  %v765_v35 = vpop.permute.xlu0 %764 }
 0x209   :  { %v965_v51 = vmul.f32 %v2174_v40, %v895_v10  ;;  %v995_v40 = vld [vmem:[%s2309_s1 + $0x1d8] sm:$0xff] }
 0x20d   :  { %v2176_v23 = vpop.permute.xlu1 %1041  ;;  %v948_v9 = vpop.permute.xlu0 %947 }
 0x20e   :  { %v1063_v55 = vmul.f32 %v2176_v23, %v993_v45  ;;  %v966_v16 = vmul.f32 %v948_v9, %v896_v63  ;;  %v994_v23 = vld [vmem:[%s2309_s1 + $0x1d0] sm:$0xff] }
 0x212   :  { %v2178_v44 = vpop.permute.xlu1 %1139  ;;  %v1144_v53 = vpop.permute.xlu0 %1143 }
 0x217   :  { %v842_v13 = vpop.permute.xlu1 %841 }
 0x218   :  { %v866_v57 = vmul.f32 %v842_v13, %v796_v52  ;;  %v897_v13 = vld [vmem:[%s2309_s1 + $0x168] sm:$0xff]  ;;  %v1173_v52 = vadd.f32 %v1159_v36, %v1075_v21 }
 0x21a   :  { %v880_v2 = vadd.f32 %v866_v57, %v782_v59  ;;  %v784_v57 = vmul.f32 %v765_v35, %v700_v39  ;;  %v1161_v59 = vmul.f32 %v2178_v44, %v1091_v12  ;;  %v1203_v1 = vsel %vm1179_vm4, %v1173_v52, 0.0  ;;  %v1092_v35 = vld [vmem:[%s2309_s1 + $0x240] sm:$0xff]  ;;  %v1093_v44 = vld [vmem:[%s2309_s1 + $0x248] sm:$0xff] }
 0x21b   :  { %v1204_v7 = vadd.f32 %v1203_v1, %v1202_v25 }
 0x21c   :  { %v1038_v50 = vpop.permute.xlu1 %1037  ;;  %v978_v32 = vadd.f32 %v964_v28, %v880_v2 }
 0x21d   :  { %v1062_v8 = vmul.f32 %v1038_v50, %v992_v18  ;;  %v1148_v18 = vpop.permute.xlu0 %1147 }
 0x21f   :  { %v1076_v0 = vadd.f32 %v1062_v8, %v978_v32  ;;  %v1162_v32 = vmul.f32 %v1144_v53, %v1092_v35  ;;  %v1163_v8 = vmul.f32 %v1148_v18, %v1093_v44 }
 0x221   :  { %v770_v58 = vpop.permute.xlu1 %769  ;;  %v1174_v31 = vadd.f32 %v1160_v48, %v1076_v0 }
 0x222   :  { %v785_v50 = vmul.f32 %v770_v58, %v701_v38  ;;  %v979_v58 = vadd.f32 %v965_v51, %v881_v27  ;;  %v1086_v38 = vld [vmem:[%s2309_s1 + $0x210] sm:$0xff] }
 0x223   :  { %v1205_v3 = vsel %vm1179_vm4, %v1174_v31, 0.0 }
 0x224   :  { %v883_v60 = vadd.f32 %v869_v26, %v785_v50  ;;  %v1077_v2 = vadd.f32 %v1063_v55, %v979_v58  ;;  %v1206_v62 = vadd.f32 %v1205_v3, %v1204_v7 }
 0x226   :  { %v952_v14 = vpop.permute.xlu1 %951 }
 0x227   :  { %v967_v6 = vmul.f32 %v952_v14, %v897_v13  ;;  %v1175_v14 = vadd.f32 %v1161_v59, %v1077_v2 }
 0x229   :  { %v981_v4 = vadd.f32 %v967_v6, %v883_v60  ;;  %v1207_v9 = vsel %vm1179_vm4, %v1175_v14, 0.0 }
 0x22a   :  { %v1208_v36 = vadd.f32 %v1207_v9, %v1206_v62 }
 0x22b   :  { %v1050_v56 = vpop.permute.xlu1 %1049 }
 0x22c   :  { %v1065_v61 = vmul.f32 %v1050_v56, %v995_v40  ;;  %v1178_v40 = vld [vmem:[%s2309_s1 + $0x250] sm:$0x1] }
 0x22e   :  { %v1079_v30 = vadd.f32 %v1065_v61, %v981_v4 }
 0x230   :  { %v850_v46 = vpop.permute.xlu1 %849  ;;  %v1177_v34 = vadd.f32 %v1163_v8, %v1079_v30 }
 0x231   :  { %v868_v15 = vmul.f32 %v850_v46, %v798_v11 }
 0x232   :  { %v1211_v42 = vsel %vm1179_vm4, %v1177_v34, 0.0 }
 0x233   :  { %v882_v17 = vadd.f32 %v868_v15, %v784_v57 }
 0x235   :  { %v1046_v28 = vpop.permute.xlu1 %1045  ;;  %v980_v29 = vadd.f32 %v966_v16, %v882_v17 }
 0x236   :  { %v1064_v49 = vmul.f32 %v1046_v28, %v994_v23 }
 0x238   :  { %v1078_v19 = vadd.f32 %v1064_v49, %v980_v29 }
 0x23a   :  { %v1176_v54 = vadd.f32 %v1162_v32, %v1078_v19  ;;  %v1116_v21 = vpop.permute.xlu1 %1115 }
 0x23b   :  { %v1155_v37 = vmul.f32 %v1116_v21, %v1085_v33 }
 0x23c   :  { %v1209_v10 = vsel %vm1179_vm4, %v1176_v54, 0.0 }
 0x23d   :  { %v1210_v56 = vadd.f32 %v1209_v10, %v1208_v36  ;;  %v1169_v41 = vadd.f32 %v1155_v37, %v2132_v43 }
 0x23e   :  { %v1120_v0 = vpop.permute.xlu1 %1119 }
 0x23f   :  { %v1212_v22 = vadd.f32 %v1211_v42, %v1210_v56  ;;  %v1189_v45 = vsel %vm1179_vm4, %v1169_v41, 0.0  ;;  %v1156_v13 = vmul.f32 %v1120_v0, %v1086_v38 }
 0x240   :  { %v1190_v47 = vadd.f32 %v1189_v45, %v2147_v5 }
 0x241   :  { %v1213_v48 = vrot.slane %v1212_v22, 4  ;;  %v1170_v51 = vadd.f32 %v1156_v13, %v2172_v20 }
 0x243   :  { %v1214_v39 = vadd.f32 %v1213_v48, %v1212_v22  ;;  %v1191_v50 = vsel %vm1179_vm4, %v1170_v51, 0.0 }
 0x244   :  { %v1192_v11 = vadd.f32 %v1191_v50, %v1190_v47 }
 0x245   :  { %v1215_v24 = vrot.slane %v1214_v39, 2 }
 0x246   :  { %v1193_v52 = vrot.slane %v1192_v11, 4 }
 0x247   :  { %v1216_v26 = vadd.f32 %v1215_v24, %v1214_v39 }
 0x248   :  { %v1194_v43 = vadd.f32 %v1193_v52, %v1192_v11 }
 0x249   :  { %v1217_v12 = vrot.slane %v1216_v26, 1 }
 0x24a   :  { %v1195_v53 = vrot.slane %v1194_v43, 2 }
 0x24b   :  { %v1218_v27 = vadd.f32 %v1217_v12, %v1216_v26 }
 0x24c   :  { %v1196_v55 = vadd.f32 %v1195_v53, %v1194_v43 }
 0x24d   :  { %v1219_v63 = vadd.f32 %v1218_v27, %v1178_v40 }
 0x24e   :  { %v1197_v5 = vrot.slane %v1196_v55, 1 }
 0x24f   :  { %v1221_v6 = vrot.slane %v1219_v63, 7 }
 0x250   :  { %v1198_v31 = vadd.f32 %v1197_v5, %v1196_v55 }
 0x252   :  { %v1199_v20 = vadd.f32 %v1198_v31, %v1178_v40 }
 0x254   :  { %v1223_v46 = vsel %vm241_vm0, %v1199_v20, %v1221_v6 }
 0x255   :  { %1225 = vst.msk [vmem:[#allocation2] sm:$0x3] %vm1224_vm5, %v1223_v46 }
 0x256   :  { %1549 = shalt.err (!%p1546_p4)
}
 0x257   :  { %s1550_s17 = scalar_lea.hbm %s2310_s2, 32 }
 0x258   :  { %p1551_p5 = scmp.ne.s32.totalorder %s2310_s2, %s1550_s17  ;;  %p1554_p6 = scmp.lt.u32.totalorder %s1550_s17, %s2310_s2 }
 0x25a   :  { %p1556_p7 = pnand %p1554_p6, %p1551_p5 }
 0x25c   :  { %1559 = shalt.err (!%p1556_p7)
}
 0x25d   :  { %1235 = dma.vmem_to_hbm [thread:$0]  %s1233_s15, 32, %s2310_s2, [#allocation3]  }
 0x25e   :  { %1560 = dma.done.wait [#allocation3], 32  }
 0x25f   :  { %1561 = vsyncadd [#allocation3], 4294967264 }
 0x260   :  { %1239 = vsyncpa [#allocation3], 1 }

</bundles_post_ra>
